<compile_context>
chip_gen: v7x
topology: tpu7x:2x2x1
jax: 0.10.0
libtpu: 0.0.40
codegen_flags: <defaults>
</compile_context>

<pallas_src>
import jax
import jax.numpy as jnp
import numpy as np
from jax.experimental import pallas as pl
from jax.experimental.pallas import tpu as pltpu


def _iir_kernel(xt_ref, bt_ref, at_ref, out_ref, yc_ref):
    """SimpleIIRFilter forward.  j = feature axis, kept on lanes everywhere.

    xt_ref : (n, n, n)      xt[m, i, j] = x[i, j, m]   (tap-major input)
    bt_ref : (order+1, n)   bt[k, j]    = b[0, j, k]
    at_ref : (order,   n)   at[k, j]    = a[0, j, k]
    out_ref: (n, n, n)      y in the module's native (r, i, j) layout
    yc_ref : (n, n, n) f32  carry: yc[i, m, j] = y[i, j, m]  (transposed copy of y,
                            output-row on the leading axis, tap on sublanes)
    """
    order = at_ref.shape[0]
    n = xt_ref.shape[0]
    f32 = jnp.float32

    xt = xt_ref[...].astype(f32)
    bt = bt_ref[...].astype(f32)
    at = at_ref[...].astype(f32)

    # Hoisted tap-weight broadcasts (feature on lanes, broadcast along sublanes).
    b_bc = [jnp.broadcast_to(bt[k:k + 1, :], (n, n)) for k in range(order + 1)]
    a_bc = [jnp.broadcast_to(at[k:k + 1, :], (n, n)) for k in range(order)]

    # ---- Feedforward, hoisted off the serial chain (depends only on x and b) ----
    # s1[r][i, j]  = sum_k x[i, j, l+k] * b[0, j, k]     (l = r - order)
    # s1T[r][m, j] = s1[r][j, m]                         (for the carry's layout)
    s1, s1T = [], []
    for r in range(order, n):
        l = r - order
        acc = xt[l] * b_bc[0]
        for k in range(1, order + 1):
            acc = acc + xt[l + k] * b_bc[k]
        s1.append(acc)
        s1T.append(acc.T)

    # ---- init: y = zeros_like(x); rows < order are never written ----
    yc_ref[...] = jnp.zeros_like(yc_ref)
    zero_slab = jnp.zeros((n, n), dtype=out_ref.dtype)
    for r in range(order):
        out_ref[r] = zero_slab

    # ---- serial recurrence: O(order*n^2) work + one (n,n) transpose per step ----
    for r in range(order, n):
        l = r - order
        s1_r = s1[r - order]
        s1T_r = s1T[r - order]

        # Read-after-write: the module writes y[r] = s1_r before reading
        # y[..., l:r], so row r of the carry must expose s1_r for this step's read.
        yc_ref[r] = s1T_r

        # s2[i, j] = sum_k y[i, j, l+k] * a[0, j, k]
        #   rows i > r are still zero, rows i < r hold finals from their own step,
        #   row i == r holds s1_r -- exactly the torch read-after-write semantics.
        s2 = yc_ref[:, l, :] * a_bc[0]
        for k in range(1, order):
            s2 = s2 + yc_ref[:, l + k, :] * a_bc[k]

        val = s1_r - s2                      # final y[r] in native (i, j) layout
        out_ref[r] = val.astype(out_ref.dtype)   # lane-dense leading-slab store
        yc_ref[r] = s1T_r - s2.T             # finalize carry row r for later steps


def simple_iir_filter(x, b, a):
    """Forward of SimpleIIRFilter.  x: (N,N,N) cubic; b: (1,N,order+1); a: (1,N,order)."""
    n0, n1, n2 = x.shape
    if not (n0 == n1 == n2):
        raise ValueError(
            "SimpleIIRFilter semantics require a cubic input "
            f"(x.shape[0] == x.shape[1] == x.shape[2]); got {x.shape}")
    order = a.shape[-1]
    if order < 1:
        raise ValueError("order must be >= 1")
    assert b.shape == (1, n1, order + 1), b.shape
    assert a.shape == (1, n1, order), a.shape

    # Layout plumbing outside the kernel (fused by XLA with the producers).
    xt = jnp.transpose(x, (2, 0, 1))      # (tap, i, j)   xt[m, i, j] = x[i, j, m]
    bt = jnp.transpose(b[0], (1, 0))      # (order+1, j)  bt[k, j]    = b[0, j, k]
    at = jnp.transpose(a[0], (1, 0))      # (order,   j)  at[k, j]    = a[0, j, k]

    # Output comes back in the module's native layout -> no output transpose.
    return pl.pallas_call(
        _iir_kernel,
        out_shape=jax.ShapeDtypeStruct(x.shape, x.dtype),
        in_specs=[
            pl.BlockSpec(memory_space=pltpu.MemorySpace.VMEM),
            pl.BlockSpec(memory_space=pltpu.MemorySpace.VMEM),
            pl.BlockSpec(memory_space=pltpu.MemorySpace.VMEM),
        ],
        out_specs=pl.BlockSpec(memory_space=pltpu.MemorySpace.VMEM),
        scratch_shapes=[pltpu.VMEM((n0, n0, n0), jnp.float32)],
    )(xt, bt, at)


def _reference(x, b, a):
    """NumPy port of the PyTorch forward, for correctness checking."""
    x = np.asarray(x)
    b = np.asarray(b)
    a = np.asarray(a)
    y = np.zeros_like(x)
    order = a.shape[-1]
    for r in range(order, x.shape[1]):
        l = r - order
        y[r] = (x[..., l:r + 1] * b).sum(axis=-1)
        y[r] -= (y[..., l:r] * a).sum(axis=-1)
    return y


if __name__ == "__main__":
    order = 2
    features = 8   # cubic requirement: all three dims of x equal `features`

    key = jax.random.PRNGKey(0)
    kx, kb, ka = jax.random.split(key, 3)
    x = jax.random.normal(kx, (features, features, features), dtype=jnp.float32)
    # Deterministic "parameters", same shapes/scale as the nn.Module __init__:
    b = jax.random.normal(kb, (1, features, order + 1), dtype=jnp.float32) * 0.1
    a = jax.random.normal(ka, (1, features, order), dtype=jnp.float32) * 0.1

    y = jax.block_until_ready(jax.jit(simple_iir_filter)(x, b, a))

    y_ref = _reference(x, b, a)
    np.testing.assert_allclose(np.asarray(y), y_ref, rtol=1e-5, atol=1e-5)
    print("KERNEL_OK")
</pallas_src>

<mosaic_0001>
module attributes {stable_mosaic.version = 11 : i64} {
  func.func @_iir_kernel(%arg0: memref<8x8x8xf32, #tpu.memory_space<vmem>>, %arg1: memref<3x8xf32, #tpu.memory_space<vmem>>, %arg2: memref<2x8xf32, #tpu.memory_space<vmem>>, %arg3: memref<8x8x8xf32, #tpu.memory_space<vmem>>, %arg4: memref<8x8x8xf32, #tpu.memory_space<vmem>>) attributes {dimension_semantics = [], scalar_prefetch = 0 : i64, scratch_operands = 1 : i64, tpu.core_type = #tpu.core_type<tc>} {
    %c0 = arith.constant 0 : index
    %c0_0 = arith.constant 0 : index
    %c0_1 = arith.constant 0 : index
    %0 = vector.load %arg0[%c0, %c0_0, %c0_1] : memref<8x8x8xf32, #tpu.memory_space<vmem>>, vector<8x8x8xf32>
    %c0_2 = arith.constant 0 : index
    %c0_3 = arith.constant 0 : index
    %1 = vector.load %arg1[%c0_2, %c0_3] : memref<3x8xf32, #tpu.memory_space<vmem>>, vector<3x8xf32>
    %c0_4 = arith.constant 0 : index
    %c0_5 = arith.constant 0 : index
    %2 = vector.load %arg2[%c0_4, %c0_5] : memref<2x8xf32, #tpu.memory_space<vmem>>, vector<2x8xf32>
    %3 = vector.extract_strided_slice %1 {offsets = [0, 0], sizes = [1, 8], strides = [1, 1]} : vector<3x8xf32> to vector<1x8xf32>
    %4 = vector.shape_cast %3 : vector<1x8xf32> to vector<1x8xf32>
    %5 = vector.broadcast %4 : vector<1x8xf32> to vector<8x8xf32>
    %6 = vector.extract_strided_slice %1 {offsets = [1, 0], sizes = [1, 8], strides = [1, 1]} : vector<3x8xf32> to vector<1x8xf32>
    %7 = vector.shape_cast %6 : vector<1x8xf32> to vector<1x8xf32>
    %8 = vector.broadcast %7 : vector<1x8xf32> to vector<8x8xf32>
    %9 = vector.extract_strided_slice %1 {offsets = [2, 0], sizes = [1, 8], strides = [1, 1]} : vector<3x8xf32> to vector<1x8xf32>
    %10 = vector.shape_cast %9 : vector<1x8xf32> to vector<1x8xf32>
    %11 = vector.broadcast %10 : vector<1x8xf32> to vector<8x8xf32>
    %12 = vector.extract_strided_slice %2 {offsets = [0, 0], sizes = [1, 8], strides = [1, 1]} : vector<2x8xf32> to vector<1x8xf32>
    %13 = vector.shape_cast %12 : vector<1x8xf32> to vector<1x8xf32>
    %14 = vector.broadcast %13 : vector<1x8xf32> to vector<8x8xf32>
    %15 = vector.extract_strided_slice %2 {offsets = [1, 0], sizes = [1, 8], strides = [1, 1]} : vector<2x8xf32> to vector<1x8xf32>
    %16 = vector.shape_cast %15 : vector<1x8xf32> to vector<1x8xf32>
    %17 = vector.broadcast %16 : vector<1x8xf32> to vector<8x8xf32>
    %18 = vector.extract_strided_slice %0 {offsets = [0, 0, 0], sizes = [1, 8, 8], strides = [1, 1, 1]} : vector<8x8x8xf32> to vector<1x8x8xf32>
    %19 = vector.shape_cast %18 : vector<1x8x8xf32> to vector<8x8xf32>
    %20 = arith.mulf %19, %5 : vector<8x8xf32>
    %21 = vector.extract_strided_slice %0 {offsets = [1, 0, 0], sizes = [1, 8, 8], strides = [1, 1, 1]} : vector<8x8x8xf32> to vector<1x8x8xf32>
    %22 = vector.shape_cast %21 : vector<1x8x8xf32> to vector<8x8xf32>
    %23 = arith.mulf %22, %8 : vector<8x8xf32>
    %24 = arith.addf %20, %23 : vector<8x8xf32>
    %25 = vector.extract_strided_slice %0 {offsets = [2, 0, 0], sizes = [1, 8, 8], strides = [1, 1, 1]} : vector<8x8x8xf32> to vector<1x8x8xf32>
    %26 = vector.shape_cast %25 : vector<1x8x8xf32> to vector<8x8xf32>
    %27 = arith.mulf %26, %11 : vector<8x8xf32>
    %28 = arith.addf %24, %27 : vector<8x8xf32>
    %29 = tpu.transpose %28, [1, 0] : vector<8x8xf32> -> vector<8x8xf32>
    %30 = vector.extract_strided_slice %0 {offsets = [1, 0, 0], sizes = [1, 8, 8], strides = [1, 1, 1]} : vector<8x8x8xf32> to vector<1x8x8xf32>
    %31 = vector.shape_cast %30 : vector<1x8x8xf32> to vector<8x8xf32>
    %32 = arith.mulf %31, %5 : vector<8x8xf32>
    %33 = vector.extract_strided_slice %0 {offsets = [2, 0, 0], sizes = [1, 8, 8], strides = [1, 1, 1]} : vector<8x8x8xf32> to vector<1x8x8xf32>
    %34 = vector.shape_cast %33 : vector<1x8x8xf32> to vector<8x8xf32>
    %35 = arith.mulf %34, %8 : vector<8x8xf32>
    %36 = arith.addf %32, %35 : vector<8x8xf32>
    %37 = vector.extract_strided_slice %0 {offsets = [3, 0, 0], sizes = [1, 8, 8], strides = [1, 1, 1]} : vector<8x8x8xf32> to vector<1x8x8xf32>
    %38 = vector.shape_cast %37 : vector<1x8x8xf32> to vector<8x8xf32>
    %39 = arith.mulf %38, %11 : vector<8x8xf32>
    %40 = arith.addf %36, %39 : vector<8x8xf32>
    %41 = tpu.transpose %40, [1, 0] : vector<8x8xf32> -> vector<8x8xf32>
    %42 = vector.extract_strided_slice %0 {offsets = [2, 0, 0], sizes = [1, 8, 8], strides = [1, 1, 1]} : vector<8x8x8xf32> to vector<1x8x8xf32>
    %43 = vector.shape_cast %42 : vector<1x8x8xf32> to vector<8x8xf32>
    %44 = arith.mulf %43, %5 : vector<8x8xf32>
    %45 = vector.extract_strided_slice %0 {offsets = [3, 0, 0], sizes = [1, 8, 8], strides = [1, 1, 1]} : vector<8x8x8xf32> to vector<1x8x8xf32>
    %46 = vector.shape_cast %45 : vector<1x8x8xf32> to vector<8x8xf32>
    %47 = arith.mulf %46, %8 : vector<8x8xf32>
    %48 = arith.addf %44, %47 : vector<8x8xf32>
    %49 = vector.extract_strided_slice %0 {offsets = [4, 0, 0], sizes = [1, 8, 8], strides = [1, 1, 1]} : vector<8x8x8xf32> to vector<1x8x8xf32>
    %50 = vector.shape_cast %49 : vector<1x8x8xf32> to vector<8x8xf32>
    %51 = arith.mulf %50, %11 : vector<8x8xf32>
    %52 = arith.addf %48, %51 : vector<8x8xf32>
    %53 = tpu.transpose %52, [1, 0] : vector<8x8xf32> -> vector<8x8xf32>
    %54 = vector.extract_strided_slice %0 {offsets = [3, 0, 0], sizes = [1, 8, 8], strides = [1, 1, 1]} : vector<8x8x8xf32> to vector<1x8x8xf32>
    %55 = vector.shape_cast %54 : vector<1x8x8xf32> to vector<8x8xf32>
    %56 = arith.mulf %55, %5 : vector<8x8xf32>
    %57 = vector.extract_strided_slice %0 {offsets = [4, 0, 0], sizes = [1, 8, 8], strides = [1, 1, 1]} : vector<8x8x8xf32> to vector<1x8x8xf32>
    %58 = vector.shape_cast %57 : vector<1x8x8xf32> to vector<8x8xf32>
    %59 = arith.mulf %58, %8 : vector<8x8xf32>
    %60 = arith.addf %56, %59 : vector<8x8xf32>
    %61 = vector.extract_strided_slice %0 {offsets = [5, 0, 0], sizes = [1, 8, 8], strides = [1, 1, 1]} : vector<8x8x8xf32> to vector<1x8x8xf32>
    %62 = vector.shape_cast %61 : vector<1x8x8xf32> to vector<8x8xf32>
    %63 = arith.mulf %62, %11 : vector<8x8xf32>
    %64 = arith.addf %60, %63 : vector<8x8xf32>
    %65 = tpu.transpose %64, [1, 0] : vector<8x8xf32> -> vector<8x8xf32>
    %66 = vector.extract_strided_slice %0 {offsets = [4, 0, 0], sizes = [1, 8, 8], strides = [1, 1, 1]} : vector<8x8x8xf32> to vector<1x8x8xf32>
    %67 = vector.shape_cast %66 : vector<1x8x8xf32> to vector<8x8xf32>
    %68 = arith.mulf %67, %5 : vector<8x8xf32>
    %69 = vector.extract_strided_slice %0 {offsets = [5, 0, 0], sizes = [1, 8, 8], strides = [1, 1, 1]} : vector<8x8x8xf32> to vector<1x8x8xf32>
    %70 = vector.shape_cast %69 : vector<1x8x8xf32> to vector<8x8xf32>
    %71 = arith.mulf %70, %8 : vector<8x8xf32>
    %72 = arith.addf %68, %71 : vector<8x8xf32>
    %73 = vector.extract_strided_slice %0 {offsets = [6, 0, 0], sizes = [1, 8, 8], strides = [1, 1, 1]} : vector<8x8x8xf32> to vector<1x8x8xf32>
    %74 = vector.shape_cast %73 : vector<1x8x8xf32> to vector<8x8xf32>
    %75 = arith.mulf %74, %11 : vector<8x8xf32>
    %76 = arith.addf %72, %75 : vector<8x8xf32>
    %77 = tpu.transpose %76, [1, 0] : vector<8x8xf32> -> vector<8x8xf32>
    %78 = vector.extract_strided_slice %0 {offsets = [5, 0, 0], sizes = [1, 8, 8], strides = [1, 1, 1]} : vector<8x8x8xf32> to vector<1x8x8xf32>
    %79 = vector.shape_cast %78 : vector<1x8x8xf32> to vector<8x8xf32>
    %80 = arith.mulf %79, %5 : vector<8x8xf32>
    %81 = vector.extract_strided_slice %0 {offsets = [6, 0, 0], sizes = [1, 8, 8], strides = [1, 1, 1]} : vector<8x8x8xf32> to vector<1x8x8xf32>
    %82 = vector.shape_cast %81 : vector<1x8x8xf32> to vector<8x8xf32>
    %83 = arith.mulf %82, %8 : vector<8x8xf32>
    %84 = arith.addf %80, %83 : vector<8x8xf32>
    %85 = vector.extract_strided_slice %0 {offsets = [7, 0, 0], sizes = [1, 8, 8], strides = [1, 1, 1]} : vector<8x8x8xf32> to vector<1x8x8xf32>
    %86 = vector.shape_cast %85 : vector<1x8x8xf32> to vector<8x8xf32>
    %87 = arith.mulf %86, %11 : vector<8x8xf32>
    %88 = arith.addf %84, %87 : vector<8x8xf32>
    %89 = tpu.transpose %88, [1, 0] : vector<8x8xf32> -> vector<8x8xf32>
    %cst = arith.constant 0.000000e+00 : f32
    %90 = vector.broadcast %cst : f32 to vector<8x8x8xf32>
    %c0_6 = arith.constant 0 : index
    %c0_7 = arith.constant 0 : index
    %c0_8 = arith.constant 0 : index
    %91 = vector.load %arg4[%c0_6, %c0_7, %c0_8] : memref<8x8x8xf32, #tpu.memory_space<vmem>>, vector<8x8x8xf32>
    tpu.vector_store %arg4[%c0_6, %c0_7, %c0_8], %90 {strides = array<i32>} : memref<8x8x8xf32, #tpu.memory_space<vmem>>, vector<8x8x8xf32>,
    %cst_9 = arith.constant 0.000000e+00 : f32
    %92 = vector.broadcast %cst_9 : f32 to vector<8x8xf32>
    %c0_10 = arith.constant 0 : index
    %c0_11 = arith.constant 0 : index
    %c0_12 = arith.constant 0 : index
    %93 = vector.load %arg3[%c0_10, %c0_11, %c0_12] : memref<8x8x8xf32, #tpu.memory_space<vmem>>, vector<1x8x8xf32>
    %94 = vector.shape_cast %93 : vector<1x8x8xf32> to vector<8x8xf32>
    %95 = vector.shape_cast %92 : vector<8x8xf32> to vector<1x8x8xf32>
    tpu.vector_store %arg3[%c0_10, %c0_11, %c0_12], %95 {strides = array<i32>} : memref<8x8x8xf32, #tpu.memory_space<vmem>>, vector<1x8x8xf32>,
    %c1 = arith.constant 1 : index
    %c0_13 = arith.constant 0 : index
    %c0_14 = arith.constant 0 : index
    %96 = vector.load %arg3[%c1, %c0_13, %c0_14] : memref<8x8x8xf32, #tpu.memory_space<vmem>>, vector<1x8x8xf32>
    %97 = vector.shape_cast %96 : vector<1x8x8xf32> to vector<8x8xf32>
    %98 = vector.shape_cast %92 : vector<8x8xf32> to vector<1x8x8xf32>
    tpu.vector_store %arg3[%c1, %c0_13, %c0_14], %98 {strides = array<i32>} : memref<8x8x8xf32, #tpu.memory_space<vmem>>, vector<1x8x8xf32>,
    %c2 = arith.constant 2 : index
    %c0_15 = arith.constant 0 : index
    %c0_16 = arith.constant 0 : index
    %99 = vector.load %arg4[%c2, %c0_15, %c0_16] : memref<8x8x8xf32, #tpu.memory_space<vmem>>, vector<1x8x8xf32>
    %100 = vector.shape_cast %99 : vector<1x8x8xf32> to vector<8x8xf32>
    %101 = vector.shape_cast %29 : vector<8x8xf32> to vector<1x8x8xf32>
    tpu.vector_store %arg4[%c2, %c0_15, %c0_16], %101 {strides = array<i32>} : memref<8x8x8xf32, #tpu.memory_space<vmem>>, vector<1x8x8xf32>,
    %c0_17 = arith.constant 0 : index
    %c0_18 = arith.constant 0 : index
    %c0_19 = arith.constant 0 : index
    %102 = vector.load %arg4[%c0_17, %c0_18, %c0_19] : memref<8x8x8xf32, #tpu.memory_space<vmem>>, vector<8x1x8xf32>
    %103 = vector.shape_cast %102 : vector<8x1x8xf32> to vector<8x8xf32>
    %104 = arith.mulf %103, %14 : vector<8x8xf32>
    %c0_20 = arith.constant 0 : index
    %c1_21 = arith.constant 1 : index
    %c0_22 = arith.constant 0 : index
    %105 = vector.load %arg4[%c0_20, %c1_21, %c0_22] : memref<8x8x8xf32, #tpu.memory_space<vmem>>, vector<8x1x8xf32>
    %106 = vector.shape_cast %105 : vector<8x1x8xf32> to vector<8x8xf32>
    %107 = arith.mulf %106, %17 : vector<8x8xf32>
    %108 = arith.addf %104, %107 : vector<8x8xf32>
    %109 = arith.subf %28, %108 : vector<8x8xf32>
    %c2_23 = arith.constant 2 : index
    %c0_24 = arith.constant 0 : index
    %c0_25 = arith.constant 0 : index
    %110 = vector.load %arg3[%c2_23, %c0_24, %c0_25] : memref<8x8x8xf32, #tpu.memory_space<vmem>>, vector<1x8x8xf32>
    %111 = vector.shape_cast %110 : vector<1x8x8xf32> to vector<8x8xf32>
    %112 = vector.shape_cast %109 : vector<8x8xf32> to vector<1x8x8xf32>
    tpu.vector_store %arg3[%c2_23, %c0_24, %c0_25], %112 {strides = array<i32>} : memref<8x8x8xf32, #tpu.memory_space<vmem>>, vector<1x8x8xf32>,
    %113 = tpu.transpose %108, [1, 0] : vector<8x8xf32> -> vector<8x8xf32>
    %114 = arith.subf %29, %113 : vector<8x8xf32>
    %c2_26 = arith.constant 2 : index
    %c0_27 = arith.constant 0 : index
    %c0_28 = arith.constant 0 : index
    %115 = vector.load %arg4[%c2_26, %c0_27, %c0_28] : memref<8x8x8xf32, #tpu.memory_space<vmem>>, vector<1x8x8xf32>
    %116 = vector.shape_cast %115 : vector<1x8x8xf32> to vector<8x8xf32>
    %117 = vector.shape_cast %114 : vector<8x8xf32> to vector<1x8x8xf32>
    tpu.vector_store %arg4[%c2_26, %c0_27, %c0_28], %117 {strides = array<i32>} : memref<8x8x8xf32, #tpu.memory_space<vmem>>, vector<1x8x8xf32>,
    %c3 = arith.constant 3 : index
    %c0_29 = arith.constant 0 : index
    %c0_30 = arith.constant 0 : index
    %118 = vector.load %arg4[%c3, %c0_29, %c0_30] : memref<8x8x8xf32, #tpu.memory_space<vmem>>, vector<1x8x8xf32>
    %119 = vector.shape_cast %118 : vector<1x8x8xf32> to vector<8x8xf32>
    %120 = vector.shape_cast %41 : vector<8x8xf32> to vector<1x8x8xf32>
    tpu.vector_store %arg4[%c3, %c0_29, %c0_30], %120 {strides = array<i32>} : memref<8x8x8xf32, #tpu.memory_space<vmem>>, vector<1x8x8xf32>,
    %c0_31 = arith.constant 0 : index
    %c1_32 = arith.constant 1 : index
    %c0_33 = arith.constant 0 : index
    %121 = vector.load %arg4[%c0_31, %c1_32, %c0_33] : memref<8x8x8xf32, #tpu.memory_space<vmem>>, vector<8x1x8xf32>
    %122 = vector.shape_cast %121 : vector<8x1x8xf32> to vector<8x8xf32>
    %123 = arith.mulf %122, %14 : vector<8x8xf32>
    %c0_34 = arith.constant 0 : index
    %c2_35 = arith.constant 2 : index
    %c0_36 = arith.constant 0 : index
    %124 = vector.load %arg4[%c0_34, %c2_35, %c0_36] : memref<8x8x8xf32, #tpu.memory_space<vmem>>, vector<8x1x8xf32>
    %125 = vector.shape_cast %124 : vector<8x1x8xf32> to vector<8x8xf32>
    %126 = arith.mulf %125, %17 : vector<8x8xf32>
    %127 = arith.addf %123, %126 : vector<8x8xf32>
    %128 = arith.subf %40, %127 : vector<8x8xf32>
    %c3_37 = arith.constant 3 : index
    %c0_38 = arith.constant 0 : index
    %c0_39 = arith.constant 0 : index
    %129 = vector.load %arg3[%c3_37, %c0_38, %c0_39] : memref<8x8x8xf32, #tpu.memory_space<vmem>>, vector<1x8x8xf32>
    %130 = vector.shape_cast %129 : vector<1x8x8xf32> to vector<8x8xf32>
    %131 = vector.shape_cast %128 : vector<8x8xf32> to vector<1x8x8xf32>
    tpu.vector_store %arg3[%c3_37, %c0_38, %c0_39], %131 {strides = array<i32>} : memref<8x8x8xf32, #tpu.memory_space<vmem>>, vector<1x8x8xf32>,
    %132 = tpu.transpose %127, [1, 0] : vector<8x8xf32> -> vector<8x8xf32>
    %133 = arith.subf %41, %132 : vector<8x8xf32>
    %c3_40 = arith.constant 3 : index
    %c0_41 = arith.constant 0 : index
    %c0_42 = arith.constant 0 : index
    %134 = vector.load %arg4[%c3_40, %c0_41, %c0_42] : memref<8x8x8xf32, #tpu.memory_space<vmem>>, vector<1x8x8xf32>
    %135 = vector.shape_cast %134 : vector<1x8x8xf32> to vector<8x8xf32>
    %136 = vector.shape_cast %133 : vector<8x8xf32> to vector<1x8x8xf32>
    tpu.vector_store %arg4[%c3_40, %c0_41, %c0_42], %136 {strides = array<i32>} : memref<8x8x8xf32, #tpu.memory_space<vmem>>, vector<1x8x8xf32>,
    %c4 = arith.constant 4 : index
    %c0_43 = arith.constant 0 : index
    %c0_44 = arith.constant 0 : index
    %137 = vector.load %arg4[%c4, %c0_43, %c0_44] : memref<8x8x8xf32, #tpu.memory_space<vmem>>, vector<1x8x8xf32>
    %138 = vector.shape_cast %137 : vector<1x8x8xf32> to vector<8x8xf32>
    %139 = vector.shape_cast %53 : vector<8x8xf32> to vector<1x8x8xf32>
    tpu.vector_store %arg4[%c4, %c0_43, %c0_44], %139 {strides = array<i32>} : memref<8x8x8xf32, #tpu.memory_space<vmem>>, vector<1x8x8xf32>,
    %c0_45 = arith.constant 0 : index
    %c2_46 = arith.constant 2 : index
    %c0_47 = arith.constant 0 : index
    %140 = vector.load %arg4[%c0_45, %c2_46, %c0_47] : memref<8x8x8xf32, #tpu.memory_space<vmem>>, vector<8x1x8xf32>
    %141 = vector.shape_cast %140 : vector<8x1x8xf32> to vector<8x8xf32>
    %142 = arith.mulf %141, %14 : vector<8x8xf32>
    %c0_48 = arith.constant 0 : index
    %c3_49 = arith.constant 3 : index
    %c0_50 = arith.constant 0 : index
    %143 = vector.load %arg4[%c0_48, %c3_49, %c0_50] : memref<8x8x8xf32, #tpu.memory_space<vmem>>, vector<8x1x8xf32>
    %144 = vector.shape_cast %143 : vector<8x1x8xf32> to vector<8x8xf32>
    %145 = arith.mulf %144, %17 : vector<8x8xf32>
    %146 = arith.addf %142, %145 : vector<8x8xf32>
    %147 = arith.subf %52, %146 : vector<8x8xf32>
    %c4_51 = arith.constant 4 : index
    %c0_52 = arith.constant 0 : index
    %c0_53 = arith.constant 0 : index
    %148 = vector.load %arg3[%c4_51, %c0_52, %c0_53] : memref<8x8x8xf32, #tpu.memory_space<vmem>>, vector<1x8x8xf32>
    %149 = vector.shape_cast %148 : vector<1x8x8xf32> to vector<8x8xf32>
    %150 = vector.shape_cast %147 : vector<8x8xf32> to vector<1x8x8xf32>
    tpu.vector_store %arg3[%c4_51, %c0_52, %c0_53], %150 {strides = array<i32>} : memref<8x8x8xf32, #tpu.memory_space<vmem>>, vector<1x8x8xf32>,
    %151 = tpu.transpose %146, [1, 0] : vector<8x8xf32> -> vector<8x8xf32>
    %152 = arith.subf %53, %151 : vector<8x8xf32>
    %c4_54 = arith.constant 4 : index
    %c0_55 = arith.constant 0 : index
    %c0_56 = arith.constant 0 : index
    %153 = vector.load %arg4[%c4_54, %c0_55, %c0_56] : memref<8x8x8xf32, #tpu.memory_space<vmem>>, vector<1x8x8xf32>
    %154 = vector.shape_cast %153 : vector<1x8x8xf32> to vector<8x8xf32>
    %155 = vector.shape_cast %152 : vector<8x8xf32> to vector<1x8x8xf32>
    tpu.vector_store %arg4[%c4_54, %c0_55, %c0_56], %155 {strides = array<i32>} : memref<8x8x8xf32, #tpu.memory_space<vmem>>, vector<1x8x8xf32>,
    %c5 = arith.constant 5 : index
    %c0_57 = arith.constant 0 : index
    %c0_58 = arith.constant 0 : index
    %156 = vector.load %arg4[%c5, %c0_57, %c0_58] : memref<8x8x8xf32, #tpu.memory_space<vmem>>, vector<1x8x8xf32>
    %157 = vector.shape_cast %156 : vector<1x8x8xf32> to vector<8x8xf32>
    %158 = vector.shape_cast %65 : vector<8x8xf32> to vector<1x8x8xf32>
    tpu.vector_store %arg4[%c5, %c0_57, %c0_58], %158 {strides = array<i32>} : memref<8x8x8xf32, #tpu.memory_space<vmem>>, vector<1x8x8xf32>,
    %c0_59 = arith.constant 0 : index
    %c3_60 = arith.constant 3 : index
    %c0_61 = arith.constant 0 : index
    %159 = vector.load %arg4[%c0_59, %c3_60, %c0_61] : memref<8x8x8xf32, #tpu.memory_space<vmem>>, vector<8x1x8xf32>
    %160 = vector.shape_cast %159 : vector<8x1x8xf32> to vector<8x8xf32>
    %161 = arith.mulf %160, %14 : vector<8x8xf32>
    %c0_62 = arith.constant 0 : index
    %c4_63 = arith.constant 4 : index
    %c0_64 = arith.constant 0 : index
    %162 = vector.load %arg4[%c0_62, %c4_63, %c0_64] : memref<8x8x8xf32, #tpu.memory_space<vmem>>, vector<8x1x8xf32>
    %163 = vector.shape_cast %162 : vector<8x1x8xf32> to vector<8x8xf32>
    %164 = arith.mulf %163, %17 : vector<8x8xf32>
    %165 = arith.addf %161, %164 : vector<8x8xf32>
    %166 = arith.subf %64, %165 : vector<8x8xf32>
    %c5_65 = arith.constant 5 : index
    %c0_66 = arith.constant 0 : index
    %c0_67 = arith.constant 0 : index
    %167 = vector.load %arg3[%c5_65, %c0_66, %c0_67] : memref<8x8x8xf32, #tpu.memory_space<vmem>>, vector<1x8x8xf32>
    %168 = vector.shape_cast %167 : vector<1x8x8xf32> to vector<8x8xf32>
    %169 = vector.shape_cast %166 : vector<8x8xf32> to vector<1x8x8xf32>
    tpu.vector_store %arg3[%c5_65, %c0_66, %c0_67], %169 {strides = array<i32>} : memref<8x8x8xf32, #tpu.memory_space<vmem>>, vector<1x8x8xf32>,
    %170 = tpu.transpose %165, [1, 0] : vector<8x8xf32> -> vector<8x8xf32>
    %171 = arith.subf %65, %170 : vector<8x8xf32>
    %c5_68 = arith.constant 5 : index
    %c0_69 = arith.constant 0 : index
    %c0_70 = arith.constant 0 : index
    %172 = vector.load %arg4[%c5_68, %c0_69, %c0_70] : memref<8x8x8xf32, #tpu.memory_space<vmem>>, vector<1x8x8xf32>
    %173 = vector.shape_cast %172 : vector<1x8x8xf32> to vector<8x8xf32>
    %174 = vector.shape_cast %171 : vector<8x8xf32> to vector<1x8x8xf32>
    tpu.vector_store %arg4[%c5_68, %c0_69, %c0_70], %174 {strides = array<i32>} : memref<8x8x8xf32, #tpu.memory_space<vmem>>, vector<1x8x8xf32>,
    %c6 = arith.constant 6 : index
    %c0_71 = arith.constant 0 : index
    %c0_72 = arith.constant 0 : index
    %175 = vector.load %arg4[%c6, %c0_71, %c0_72] : memref<8x8x8xf32, #tpu.memory_space<vmem>>, vector<1x8x8xf32>
    %176 = vector.shape_cast %175 : vector<1x8x8xf32> to vector<8x8xf32>
    %177 = vector.shape_cast %77 : vector<8x8xf32> to vector<1x8x8xf32>
    tpu.vector_store %arg4[%c6, %c0_71, %c0_72], %177 {strides = array<i32>} : memref<8x8x8xf32, #tpu.memory_space<vmem>>, vector<1x8x8xf32>,
    %c0_73 = arith.constant 0 : index
    %c4_74 = arith.constant 4 : index
    %c0_75 = arith.constant 0 : index
    %178 = vector.load %arg4[%c0_73, %c4_74, %c0_75] : memref<8x8x8xf32, #tpu.memory_space<vmem>>, vector<8x1x8xf32>
    %179 = vector.shape_cast %178 : vector<8x1x8xf32> to vector<8x8xf32>
    %180 = arith.mulf %179, %14 : vector<8x8xf32>
    %c0_76 = arith.constant 0 : index
    %c5_77 = arith.constant 5 : index
    %c0_78 = arith.constant 0 : index
    %181 = vector.load %arg4[%c0_76, %c5_77, %c0_78] : memref<8x8x8xf32, #tpu.memory_space<vmem>>, vector<8x1x8xf32>
    %182 = vector.shape_cast %181 : vector<8x1x8xf32> to vector<8x8xf32>
    %183 = arith.mulf %182, %17 : vector<8x8xf32>
    %184 = arith.addf %180, %183 : vector<8x8xf32>
    %185 = arith.subf %76, %184 : vector<8x8xf32>
    %c6_79 = arith.constant 6 : index
    %c0_80 = arith.constant 0 : index
    %c0_81 = arith.constant 0 : index
    %186 = vector.load %arg3[%c6_79, %c0_80, %c0_81] : memref<8x8x8xf32, #tpu.memory_space<vmem>>, vector<1x8x8xf32>
    %187 = vector.shape_cast %186 : vector<1x8x8xf32> to vector<8x8xf32>
    %188 = vector.shape_cast %185 : vector<8x8xf32> to vector<1x8x8xf32>
    tpu.vector_store %arg3[%c6_79, %c0_80, %c0_81], %188 {strides = array<i32>} : memref<8x8x8xf32, #tpu.memory_space<vmem>>, vector<1x8x8xf32>,
    %189 = tpu.transpose %184, [1, 0] : vector<8x8xf32> -> vector<8x8xf32>
    %190 = arith.subf %77, %189 : vector<8x8xf32>
    %c6_82 = arith.constant 6 : index
    %c0_83 = arith.constant 0 : index
    %c0_84 = arith.constant 0 : index
    %191 = vector.load %arg4[%c6_82, %c0_83, %c0_84] : memref<8x8x8xf32, #tpu.memory_space<vmem>>, vector<1x8x8xf32>
    %192 = vector.shape_cast %191 : vector<1x8x8xf32> to vector<8x8xf32>
    %193 = vector.shape_cast %190 : vector<8x8xf32> to vector<1x8x8xf32>
    tpu.vector_store %arg4[%c6_82, %c0_83, %c0_84], %193 {strides = array<i32>} : memref<8x8x8xf32, #tpu.memory_space<vmem>>, vector<1x8x8xf32>,
    %c7 = arith.constant 7 : index
    %c0_85 = arith.constant 0 : index
    %c0_86 = arith.constant 0 : index
    %194 = vector.load %arg4[%c7, %c0_85, %c0_86] : memref<8x8x8xf32, #tpu.memory_space<vmem>>, vector<1x8x8xf32>
    %195 = vector.shape_cast %194 : vector<1x8x8xf32> to vector<8x8xf32>
    %196 = vector.shape_cast %89 : vector<8x8xf32> to vector<1x8x8xf32>
    tpu.vector_store %arg4[%c7, %c0_85, %c0_86], %196 {strides = array<i32>} : memref<8x8x8xf32, #tpu.memory_space<vmem>>, vector<1x8x8xf32>,
    %c0_87 = arith.constant 0 : index
    %c5_88 = arith.constant 5 : index
    %c0_89 = arith.constant 0 : index
    %197 = vector.load %arg4[%c0_87, %c5_88, %c0_89] : memref<8x8x8xf32, #tpu.memory_space<vmem>>, vector<8x1x8xf32>
    %198 = vector.shape_cast %197 : vector<8x1x8xf32> to vector<8x8xf32>
    %199 = arith.mulf %198, %14 : vector<8x8xf32>
    %c0_90 = arith.constant 0 : index
    %c6_91 = arith.constant 6 : index
    %c0_92 = arith.constant 0 : index
    %200 = vector.load %arg4[%c0_90, %c6_91, %c0_92] : memref<8x8x8xf32, #tpu.memory_space<vmem>>, vector<8x1x8xf32>
    %201 = vector.shape_cast %200 : vector<8x1x8xf32> to vector<8x8xf32>
    %202 = arith.mulf %201, %17 : vector<8x8xf32>
    %203 = arith.addf %199, %202 : vector<8x8xf32>
    %204 = arith.subf %88, %203 : vector<8x8xf32>
    %c7_93 = arith.constant 7 : index
    %c0_94 = arith.constant 0 : index
    %c0_95 = arith.constant 0 : index
    %205 = vector.load %arg3[%c7_93, %c0_94, %c0_95] : memref<8x8x8xf32, #tpu.memory_space<vmem>>, vector<1x8x8xf32>
    %206 = vector.shape_cast %205 : vector<1x8x8xf32> to vector<8x8xf32>
    %207 = vector.shape_cast %204 : vector<8x8xf32> to vector<1x8x8xf32>
    tpu.vector_store %arg3[%c7_93, %c0_94, %c0_95], %207 {strides = array<i32>} : memref<8x8x8xf32, #tpu.memory_space<vmem>>, vector<1x8x8xf32>,
    %208 = tpu.transpose %203, [1, 0] : vector<8x8xf32> -> vector<8x8xf32>
    %209 = arith.subf %89, %208 : vector<8x8xf32>
    %c7_96 = arith.constant 7 : index
    %c0_97 = arith.constant 0 : index
    %c0_98 = arith.constant 0 : index
    %210 = vector.load %arg4[%c7_96, %c0_97, %c0_98] : memref<8x8x8xf32, #tpu.memory_space<vmem>>, vector<1x8x8xf32>
    %211 = vector.shape_cast %210 : vector<1x8x8xf32> to vector<8x8xf32>
    %212 = vector.shape_cast %209 : vector<8x8xf32> to vector<1x8x8xf32>
    tpu.vector_store %arg4[%c7_96, %c0_97, %c0_98], %212 {strides = array<i32>} : memref<8x8x8xf32, #tpu.memory_space<vmem>>, vector<1x8x8xf32>,
    return
  }
}

</mosaic_0001>

<bundles_post_ra>
// kernel: simple_iir_filter.1
= control target key start
LH: loop header
LB: loop body
LE: loop exit
PB: predicated region body
PF: predicated region fallthrough
CT: control target
= control target key end

     0   :  { %v25_v0 = vlaneseq  ;;  %vm267_vm0 = vcmask 64512   ;;  %v942_v1 = vmov 0.0   ;;  %s1274_s0 = inlined_call_operand.vmem [shape: f32[8,8,8], index: 0, kind: input, shape index: {}]   ;;  %s1275_s1 = inlined_call_operand.vmem [shape: f32[3,8], index: 1, kind: input, shape index: {}]   ;;  %s1276_s2 = inlined_call_operand.vmem [shape: f32[2,8], index: 2, kind: input, shape index: {}]   ;;  %s1277_s3 = inlined_call_operand.hbm [shape: f32[8,8,8], index: 3, kind: output, shape index: {}]  }
   0x1   :  { %270 = vst.msk [vmem:[#allocation2 + $0x10] sm:$0xff] %vm267_vm0, %v942_v1  ;;  %268 = vst.msk [vmem:[#allocation2] sm:$0xff] %vm267_vm0, %v942_v1 }
   0x2   :  { %269 = vst.msk [vmem:[#allocation2 + $0x8] sm:$0xff] %vm267_vm0, %v942_v1  ;;  %271 = vst.msk [vmem:[#allocation2 + $0x18] sm:$0xff] %vm267_vm0, %v942_v1 }
   0x3   :  { %272 = vst.msk [vmem:[#allocation2 + $0x20] sm:$0xff] %vm267_vm0, %v942_v1  ;;  %273 = vst.msk [vmem:[#allocation2 + $0x28] sm:$0xff] %vm267_vm0, %v942_v1 }
   0x4   :  { %274 = vst.msk [vmem:[#allocation2 + $0x30] sm:$0xff] %vm267_vm0, %v942_v1  ;;  %275 = vst.msk [vmem:[#allocation2 + $0x38] sm:$0xff] %vm267_vm0, %v942_v1 }
   0x5   :  { %276 = vst.msk [vmem:[#allocation3] sm:$0xff] %vm267_vm0, %v942_v1  ;;  %278 = vst.msk [vmem:[#allocation3 + $0x8] sm:$0xff] %vm267_vm0, %v942_v1 }
   0x6   :  { %8 = vsyncpa [#allocation4], 0  ;;  %v26_v2 = vshrl.u32 %v25_v0, 7  ;;  %v23_v3 = vld [vmem:[%s1275_s1] sm:$0x7]  ;;  %v16_v8 = vld [vmem:[%s1274_s0 + $0x8] sm:$0xff] }
   0x7   :  { %v15_v7 = vld [vmem:[%s1274_s0] sm:$0xff]  ;;  %v988_v9 = vld [vmem:[%s1274_s0 + $0x10] sm:$0xff]  ;;  %v1009_v20 = vld [vmem:[%s1274_s0 + $0x18] sm:$0xff]  ;;  %vm330_vm1 = vcmask 1041409   ;;  %vm333_vm2 = vcmask 1042434   ;;  %vm336_vm3 = vcmask 1043459  }
   0x8   :  { %v27_v4 = vsub.s32 0, %v26_v2  ;;  %v31_v5 = vsub.s32 1, %v26_v2  ;;  %v35_v6 = vsub.s32 2, %v26_v2  ;;  %v24_v24 = vld [vmem:[%s1276_s2] sm:$0x3]  ;;  %vm339_vm4 = vcmask 1044484  }
   0x9   :  { %v282_v27 = vld [vmem:[#allocation2 + $0x8] sm:$0x1]  ;;  %v298_v28 = vld [vmem:[#allocation2 + $0x9] sm:$0x1]  ;;  %v281_v30 = vld [vmem:[#allocation2] sm:$0x1] }
   0xa   :  { %v990_v10 = vrot.slane %v23_v3, %v27_v4  ;;  %v992_v11 = vrot.slane %v23_v3, %v31_v5  ;;  %v994_v12 = vrot.slane %v23_v3, %v35_v6  ;;  %v1019_v25 = vrot.slane %v24_v24, %v27_v4  ;;  %v284_v33 = vld [vmem:[#allocation2 + $0x18] sm:$0x1]  ;;  %v297_v34 = vld [vmem:[#allocation2 + $0x1] sm:$0x1]  ;;  %v300_v35 = vld [vmem:[#allocation2 + $0x19] sm:$0x1] }
   0xb   :  { %v1021_v26 = vrot.slane %v24_v24, %v31_v5  ;;  %v285_v36 = vld [vmem:[#allocation2 + $0x20] sm:$0x1]  ;;  %v301_v37 = vld [vmem:[#allocation2 + $0x21] sm:$0x1]  ;;  %v286_v38 = vld [vmem:[#allocation2 + $0x28] sm:$0x1] }
   0xc   :  { %v45_v13 = vmul.f32 %v990_v10, %v15_v7  ;;  %v46_v14 = vmul.f32 %v992_v11, %v16_v8  ;;  %v48_v15 = vmul.f32 %v994_v12, %v988_v9  ;;  %v82_v18 = vmul.f32 %v990_v10, %v16_v8  ;;  %v302_v40 = vld [vmem:[#allocation2 + $0x29] sm:$0x1]  ;;  %v287_v41 = vld [vmem:[#allocation2 + $0x30] sm:$0x1]  ;;  %v288_v42 = vld [vmem:[#allocation2 + $0x38] sm:$0x1] }
   0xd   :  { %v83_v19 = vmul.f32 %v992_v11, %v988_v9  ;;  %v85_v22 = vmul.f32 %v994_v12, %v1009_v20  ;;  %v290_v31 = vmul.f32 %v282_v27, %v1019_v25  ;;  %v306_v32 = vmul.f32 %v298_v28, %v1021_v26  ;;  %v303_v44 = vld [vmem:[#allocation2 + $0x31] sm:$0x1]  ;;  %v304_v49 = vld [vmem:[#allocation2 + $0x39] sm:$0x1] }
   0xe   :  { %v47_v16 = vadd.f32 %v46_v14, %v45_v13  ;;  %v289_v39 = vmul.f32 %v281_v30, %v1019_v25  ;;  %v292_v43 = vmul.f32 %v284_v33, %v1019_v25  ;;  %v305_v45 = vmul.f32 %v297_v34, %v1021_v26 }
   0xf   :  { %v84_v21 = vadd.f32 %v83_v19, %v82_v18  ;;  %v308_v46 = vmul.f32 %v300_v35, %v1021_v26  ;;  %v314_v47 = vadd.f32 %v306_v32, %v290_v31  ;;  %v293_v48 = vmul.f32 %v285_v36, %v1019_v25  ;;  %v1063_v32 = vld [vmem:[%s1274_s0 + $0x20] sm:$0xff]  ;;  %v391_v35 = vld [vmem:[#allocation2 + $0x9] sm:$0x1]  ;;  %v407_v36 = vld [vmem:[#allocation2 + $0xa] sm:$0x1] }
  0x10   :  { %v1000_v17 = vadd.f32 %v48_v15, %v47_v16  ;;  %v309_v50 = vmul.f32 %v301_v37, %v1021_v26  ;;  %v294_v51 = vmul.f32 %v286_v38, %v1019_v25  ;;  %v310_v52 = vmul.f32 %v302_v40, %v1021_v26  ;;  %v390_v38 = vld [vmem:[#allocation2 + $0x1] sm:$0x1] }
  0x11   :  { %v1013_v23 = vadd.f32 %v85_v22, %v84_v21  ;;  %v295_v53 = vmul.f32 %v287_v41, %v1019_v25  ;;  %v296_v54 = vmul.f32 %v288_v42, %v1019_v25  ;;  %v311_v55 = vmul.f32 %v303_v44, %v1021_v26  ;;  %v406_v42 = vld [vmem:[#allocation2 + $0x2] sm:$0x1]  ;;  %v394_v44 = vld [vmem:[#allocation2 + $0x21] sm:$0x1] }
  0x12   :  { %50 = vxpose.xlu0.b32.start.end [1/1] (short) (narrow) %v1000_v17, 8  ;;  %v312_v58 = vmul.f32 %v304_v49, %v1021_v26  ;;  %v313_v59 = vadd.f32 %v305_v45, %v289_v39  ;;  %v316_v60 = vadd.f32 %v308_v46, %v292_v43  ;;  %v329_v61 = vrot.slane %v314_v47, 7  ;;  %v410_v45 = vld [vmem:[#allocation2 + $0x22] sm:$0x1]  ;;  %v395_v46 = vld [vmem:[#allocation2 + $0x29] sm:$0x1] }
  0x13   :  { %87 = vxpose.xlu1.b32.start.end [1/1] (short) (narrow) %v1013_v23, 8  ;;  %v317_v0 = vadd.f32 %v309_v50, %v293_v48  ;;  %v318_v1 = vadd.f32 %v310_v52, %v294_v51  ;;  %v319_v3 = vadd.f32 %v311_v55, %v295_v53  ;;  %vm342_vm5 = vcmask 1045509   ;;  %v411_v48 = vld [vmem:[#allocation2 + $0x2a] sm:$0x1]  ;;  %v396_v49 = vld [vmem:[#allocation2 + $0x31] sm:$0x1] }
  0x14   :  { %v320_v4 = vadd.f32 %v312_v58, %v296_v54  ;;  %v331_v5 = vsel %vm330_vm1, %v329_v61, %v313_v59  ;;  %v335_v6 = vrot.slane %v316_v60, 5  ;;  %vm345_vm6 = vcmask 1046534   ;;  %v397_v50 = vld [vmem:[#allocation2 + $0x39] sm:$0x1]  ;;  %v412_v51 = vld [vmem:[#allocation2 + $0x32] sm:$0x1] }
  0x15   :  { %v338_v8 = vrot.slane %v317_v0, 4  ;;  %v341_v13 = vrot.slane %v318_v1, 3  ;;  %v344_v15 = vrot.slane %v319_v3, 2  ;;  %vm348_vm7 = vcmask 1047559  }
  0x16   :  { %v347_v18 = vrot.slane %v320_v4, 1  ;;  %v119_v30 = vmul.f32 %v990_v10, %v988_v9  ;;  %v120_v31 = vmul.f32 %v992_v11, %v1009_v20  ;;  %v399_v39 = vmul.f32 %v391_v35, %v1019_v25 }
  0x17   :  { %v415_v40 = vmul.f32 %v407_v36, %v1021_v26  ;;  %v398_v47 = vmul.f32 %v390_v38, %v1019_v25  ;;  %v414_v52 = vmul.f32 %v406_v42, %v1021_v26  ;;  %v402_v55 = vmul.f32 %v394_v44, %v1019_v25  ;;  %v509_v44 = vld [vmem:[#allocation2 + $0xb] sm:$0x1] }
  0x18   :  { %v121_v33 = vadd.f32 %v120_v31, %v119_v30  ;;  %v403_v58 = vmul.f32 %v395_v46, %v1019_v25  ;;  %v419_v59 = vmul.f32 %v411_v48, %v1021_v26  ;;  %v404_v60 = vmul.f32 %v396_v49, %v1019_v25 }
  0x19   :  { %v423_v54 = vadd.f32 %v415_v40, %v399_v39  ;;  %v405_v61 = vmul.f32 %v397_v50, %v1019_v25  ;;  %v156_v38 = vmul.f32 %v990_v10, %v1009_v20  ;;  %v157_v39 = vmul.f32 %v992_v11, %v1063_v32  ;;  %v1108_v40 = vld [vmem:[%s1274_s0 + $0x28] sm:$0xff]  ;;  %v492_v50 = vld [vmem:[#allocation2 + $0x2] sm:$0x1] }
  0x1a   :  { %v517_v49 = vmul.f32 %v509_v44, %v1021_v26 }
  0x1b   :  { %v438_v4 = vrot.slane %v423_v54, 7 }
  0x92   :  { %v1023_v29 = vpop.trf.xlu0 }
  0x93   :  { %280 = vst.msk [vmem:[#allocation2 + $0x10] sm:$0xff] %vm267_vm0, %v1023_v29  ;;  %v1052_v28 = vpop.trf.xlu1 }
  0x94   :  { %389 = vst.msk [vmem:[#allocation2 + $0x18] sm:$0xff] %vm267_vm0, %v1052_v28 }
  0x9a   :  { %v283_v56 = vld [vmem:[#allocation2 + $0x10] sm:$0x1]  ;;  %v299_v57 = vld [vmem:[#allocation2 + $0x11] sm:$0x1] }
  0x9b   :  { %v291_v62 = vmul.f32 %v283_v56, %v1019_v25  ;;  %v307_v63 = vmul.f32 %v299_v57, %v1021_v26  ;;  %v393_v41 = vld [vmem:[#allocation2 + $0x19] sm:$0x1]  ;;  %v409_v43 = vld [vmem:[#allocation2 + $0x1a] sm:$0x1]  ;;  %v418_v57 = vmul.f32 %v410_v45, %v1021_v26 }
  0x9c   :  { %v417_v53 = vmul.f32 %v409_v43, %v1021_v26  ;;  %v413_v56 = vld [vmem:[#allocation2 + $0x3a] sm:$0x1]  ;;  %v493_v43 = vld [vmem:[#allocation2 + $0xa] sm:$0x1] }
  0x9d   :  { %v315_v2 = vadd.f32 %v307_v63, %v291_v62  ;;  %v420_v62 = vmul.f32 %v412_v51, %v1021_v26  ;;  %v421_v1 = vmul.f32 %v413_v56, %v1021_v26 }
  0x9f   :  { %v332_v7 = vrot.slane %v315_v2, 6  ;;  %v422_v2 = vadd.f32 %v414_v52, %v398_v47  ;;  %v501_v47 = vmul.f32 %v493_v43, %v1019_v25 }
  0xa1   :  { %v334_v14 = vsel %vm333_vm2, %v332_v7, %v331_v5  ;;  %v426_v7 = vadd.f32 %v418_v57, %v402_v55  ;;  %v513_v55 = vld [vmem:[#allocation2 + $0x2b] sm:$0x1]  ;;  %v498_v57 = vld [vmem:[#allocation2 + $0x32] sm:$0x1] }
  0xa2   :  { %v337_v16 = vsel %vm336_vm3, %v335_v6, %v334_v14  ;;  %v428_v14 = vadd.f32 %v420_v62, %v404_v60  ;;  %v525_v60 = vadd.f32 %v517_v49, %v501_v47  ;;  %v194_v47 = vmul.f32 %v992_v11, %v1108_v40 }
  0xa3   :  { %v340_v19 = vsel %vm339_vm4, %v338_v8, %v337_v16  ;;  %v427_v8 = vadd.f32 %v419_v59, %v403_v58  ;;  %v439_v16 = vsel %vm330_vm1, %v438_v4, %v422_v2  ;;  %v514_v58 = vld [vmem:[#allocation2 + $0x33] sm:$0x1]  ;;  %v521_v2 = vmul.f32 %v513_v55, %v1021_v26  ;;  %v610_v55 = vld [vmem:[#allocation2 + $0x4] sm:$0x1] }
  0xa4   :  { %v343_v21 = vsel %vm342_vm5, %v341_v13, %v340_v19  ;;  %v522_v4 = vmul.f32 %v514_v58, %v1021_v26 }
  0xa5   :  { %v346_v22 = vsel %vm345_vm6, %v344_v15, %v343_v21  ;;  %v429_v15 = vadd.f32 %v421_v1, %v405_v61  ;;  %v444_v21 = vrot.slane %v426_v7, 4  ;;  %v499_v61 = vld [vmem:[#allocation2 + $0x3a] sm:$0x1] }
  0xa6   :  { %v349_v24 = vsel %vm348_vm7, %v347_v18, %v346_v22  ;;  %v446_v22 = vrot.slane %v427_v8, 3 }
  0xa7   :  { %354 = vxpose.xlu0.b32.start.end [1/1] (short) (narrow) %v349_v24, 8  ;;  %v351_v27 = vsub.f32 %v1000_v17, %v349_v24  ;;  %v122_v17 = vmul.f32 %v994_v12, %v1063_v32  ;;  %v450_v31 = vrot.slane %v429_v15, 1 }
  0xa9   :  { %353 = vst.msk [vmem:[#allocation3 + $0x10] sm:$0xff] %vm267_vm0, %v351_v27  ;;  %v1067_v34 = vadd.f32 %v122_v17, %v121_v33  ;;  %v448_v27 = vrot.slane %v428_v14, 2 }
  0xab   :  { %124 = vxpose.xlu0.b32.start.end [1/1] (short) (narrow) %v1067_v34, 8 }
 0x127   :  { %v370_v37 = vpop.trf.xlu0 }
 0x128   :  { %v386_v9 = vsub.f32 %v1023_v29, %v370_v37  ;;  %v401_v29 = vmul.f32 %v393_v41, %v1019_v25  ;;  %v158_v41 = vadd.f32 %v157_v39, %v156_v38 }
 0x12a   :  { %387 = vst.msk [vmem:[#allocation2 + $0x10] sm:$0xff] %vm267_vm0, %v386_v9  ;;  %v425_v3 = vadd.f32 %v417_v53, %v401_v29  ;;  %v508_v29 = vld [vmem:[#allocation2 + $0x3] sm:$0x1]  ;;  %v497_v53 = vld [vmem:[#allocation2 + $0x2a] sm:$0x1] }
 0x12b   :  { %v1097_v9 = vpop.trf.xlu0  ;;  %v516_v59 = vmul.f32 %v508_v29, %v1021_v26  ;;  %v505_v1 = vmul.f32 %v497_v53, %v1019_v25  ;;  %v595_v29 = vld [vmem:[#allocation2 + $0xb] sm:$0x1] }
 0x12c   :  { %v442_v18 = vrot.slane %v425_v3, 5  ;;  %491 = vst.msk [vmem:[#allocation2 + $0x20] sm:$0xff] %vm267_vm0, %v1097_v9  ;;  %v506_v3 = vmul.f32 %v498_v57, %v1019_v25 }
 0x131   :  { %v392_v63 = vld [vmem:[#allocation2 + $0x11] sm:$0x1]  ;;  %v408_v0 = vld [vmem:[#allocation2 + $0x12] sm:$0x1]  ;;  %v510_v48 = vld [vmem:[#allocation2 + $0x13] sm:$0x1] }
 0x132   :  { %v400_v5 = vmul.f32 %v392_v63, %v1019_v25  ;;  %v416_v6 = vmul.f32 %v408_v0, %v1021_v26  ;;  %v494_v46 = vld [vmem:[#allocation2 + $0x12] sm:$0x1]  ;;  %v518_v56 = vmul.f32 %v510_v48, %v1021_v26  ;;  %v515_v63 = vld [vmem:[#allocation2 + $0x3b] sm:$0x1]  ;;  %v596_v53 = vld [vmem:[#allocation2 + $0x13] sm:$0x1] }
 0x133   :  { %v496_v51 = vld [vmem:[#allocation2 + $0x22] sm:$0x1]  ;;  %v512_v52 = vld [vmem:[#allocation2 + $0x23] sm:$0x1]  ;;  %v502_v54 = vmul.f32 %v494_v46, %v1019_v25  ;;  %v523_v7 = vmul.f32 %v515_v63, %v1021_v26  ;;  %v193_v46 = vmul.f32 %v990_v10, %v1063_v32  ;;  %v1153_v48 = vld [vmem:[%s1274_s0 + $0x30] sm:$0xff] }
 0x134   :  { %v424_v13 = vadd.f32 %v416_v6, %v400_v5  ;;  %v504_v62 = vmul.f32 %v496_v51, %v1019_v25  ;;  %v520_v0 = vmul.f32 %v512_v52, %v1021_v26  ;;  %v507_v6 = vmul.f32 %v499_v61, %v1019_v25  ;;  %v611_v51 = vld [vmem:[#allocation2 + $0xc] sm:$0x1]  ;;  %v594_v52 = vld [vmem:[#allocation2 + $0x3] sm:$0x1] }
 0x135   :  { %v526_v5 = vadd.f32 %v518_v56, %v502_v54  ;;  %v195_v49 = vadd.f32 %v194_v47, %v193_v46  ;;  %v603_v54 = vmul.f32 %v595_v29, %v1019_v25  ;;  %v612_v56 = vld [vmem:[#allocation2 + $0x14] sm:$0x1]  ;;  %v619_v57 = vmul.f32 %v611_v51, %v1021_v26 }
 0x136   :  { %v440_v19 = vrot.slane %v424_v13, 6  ;;  %v540_v13 = vrot.slane %v525_v60, 7  ;;  %v602_v61 = vmul.f32 %v594_v52, %v1019_v25 }
 0x138   :  { %v441_v24 = vsel %vm333_vm2, %v440_v19, %v439_v16  ;;  %v528_v16 = vadd.f32 %v520_v0, %v504_v62  ;;  %v604_v62 = vmul.f32 %v596_v53, %v1019_v25  ;;  %v618_v0 = vmul.f32 %v610_v55, %v1021_v26  ;;  %v22_v55 = vld [vmem:[%s1274_s0 + $0x38] sm:$0xff]  ;;  %s943_s0 = smov [#allocation3]  }
 0x139   :  { %v443_v30 = vsel %vm336_vm3, %v442_v18, %v441_v24  ;;  %v542_v24 = vrot.slane %v526_v5, 6  ;;  %v627_v5 = vadd.f32 %v619_v57, %v603_v54  ;;  %v230_v53 = vmul.f32 %v990_v10, %v1108_v40  ;;  %v712_v10 = vld [vmem:[#allocation2 + $0x5] sm:$0x1]  ;;  %s903_s30 = sshll.u32 %s943_s0, 4  ;;  %s904_s30 = int_to_ptr.vmem [resolvable:$true] %s903_s30 }
 0x13a   :  { %v445_v33 = vsel %vm339_vm4, %v444_v21, %v443_v30  ;;  %v529_v21 = vadd.f32 %v521_v2, %v505_v1  ;;  %v531_v30 = vadd.f32 %v523_v7, %v507_v6  ;;  %v620_v1 = vmul.f32 %v612_v56, %v1021_v26  ;;  %v600_v2 = vld [vmem:[#allocation2 + $0x33] sm:$0x1]  ;;  %v601_v6 = vld [vmem:[#allocation2 + $0x3b] sm:$0x1]  ;;  %v617_v7 = vld [vmem:[#allocation2 + $0x3c] sm:$0x1]  ;;  %p923_p1 = scmp.lt.s32.totalorder %s904_s30, %s904_s30 }
 0x13b   :  { %v447_v17 = vsel %vm342_vm5, %v446_v22, %v445_v33  ;;  %v530_v22 = vadd.f32 %v522_v4, %v506_v3  ;;  %v546_v33 = vrot.slane %v528_v16, 4  ;;  %v616_v4 = vld [vmem:[#allocation2 + $0x34] sm:$0x1]  ;;  %v626_v16 = vadd.f32 %v618_v0, %v602_v61  ;;  %s918_s4 = scalar_lea.vmem %s904_s30, 1024 }
 0x13c   :  { %v449_v35 = vsel %vm345_vm6, %v448_v27, %v447_v17  ;;  %v552_v39 = vrot.slane %v531_v30, 1  ;;  %v231_v54 = vmul.f32 %v992_v11, %v1153_v48  ;;  %v698_v11 = vld [vmem:[#allocation2 + $0x14] sm:$0x1]  ;;  %p919_p0 = scmp.ne.s32.totalorder %s904_s30, %s918_s4  ;;  %p924_p2 = scmp.lt.s32.totalorder %s918_s4, %s918_s4 }
 0x13d   :  { %v451_v36 = vsel %vm348_vm7, %v450_v31, %v449_v35  ;;  %v548_v35 = vrot.slane %v529_v21, 3  ;;  %v625_v21 = vmul.f32 %v617_v7, %v1021_v26 }
 0x13e   :  { %456 = vxpose.xlu1.b32.start.end [1/1] (short) (narrow) %v451_v36, 8  ;;  %v453_v37 = vsub.f32 %v1013_v23, %v451_v36  ;;  %v159_v23 = vmul.f32 %v994_v12, %v1108_v40  ;;  %v232_v56 = vadd.f32 %v231_v54, %v230_v53  ;;  %p925_p3 = por %p924_p2, %p923_p1 }
 0x140   :  { %455 = vst.msk [vmem:[#allocation3 + $0x18] sm:$0xff] %vm267_vm0, %v453_v37  ;;  %v1112_v42 = vadd.f32 %v159_v23, %v158_v41  ;;  %v550_v37 = vrot.slane %v530_v22, 2  ;;  %p926_p4 = pnand %p925_p3, %p919_p0 }
 0x142   :  { %161 = vxpose.xlu0.b32.start.end [1/1] (short) (narrow) %v1112_v42, 8 }
 0x1be   :  { %v472_v45 = vpop.trf.xlu1 }
 0x1bf   :  { %v488_v20 = vsub.f32 %v1052_v28, %v472_v45  ;;  %v500_v28 = vmul.f32 %v492_v50, %v1019_v25 }
 0x1c1   :  { %489 = vst.msk [vmem:[#allocation2 + $0x18] sm:$0xff] %vm267_vm0, %v488_v20  ;;  %v524_v8 = vadd.f32 %v516_v59, %v500_v28 }
 0x1c2   :  { %v1142_v20 = vpop.trf.xlu0 }
 0x1c3   :  { %v541_v31 = vsel %vm330_vm1, %v540_v13, %v524_v8  ;;  %593 = vst.msk [vmem:[#allocation2 + $0x28] sm:$0xff] %vm267_vm0, %v1142_v20 }
 0x1c4   :  { %v543_v36 = vsel %vm333_vm2, %v542_v24, %v541_v31  ;;  %v642_v24 = vrot.slane %v627_v5, 7 }
 0x1c8   :  { %v495_v14 = vld [vmem:[#allocation2 + $0x1a] sm:$0x1]  ;;  %v511_v15 = vld [vmem:[#allocation2 + $0x1b] sm:$0x1]  ;;  %v613_v59 = vld [vmem:[#allocation2 + $0x1c] sm:$0x1] }
 0x1c9   :  { %v503_v18 = vmul.f32 %v495_v14, %v1019_v25  ;;  %v519_v19 = vmul.f32 %v511_v15, %v1021_v26  ;;  %v597_v58 = vld [vmem:[#allocation2 + $0x1b] sm:$0x1]  ;;  %v608_v14 = vmul.f32 %v600_v2, %v1019_v25  ;;  %v624_v15 = vmul.f32 %v616_v4, %v1021_v26 }
 0x1ca   :  { %v599_v60 = vld [vmem:[#allocation2 + $0x2b] sm:$0x1]  ;;  %v615_v63 = vld [vmem:[#allocation2 + $0x2c] sm:$0x1]  ;;  %v605_v3 = vmul.f32 %v597_v58, %v1019_v25  ;;  %v713_v58 = vld [vmem:[#allocation2 + $0xd] sm:$0x1]  ;;  %v706_v4 = vmul.f32 %v698_v11, %v1019_v25 }
 0x1cb   :  { %v527_v27 = vadd.f32 %v519_v19, %v503_v18  ;;  %v607_v8 = vmul.f32 %v599_v60, %v1019_v25  ;;  %v623_v13 = vmul.f32 %v615_v63, %v1021_v26  ;;  %v628_v18 = vadd.f32 %v620_v1, %v604_v62  ;;  %v699_v62 = vld [vmem:[#allocation2 + $0x1c] sm:$0x1]  ;;  %v715_v63 = vld [vmem:[#allocation2 + $0x1d] sm:$0x1] }
 0x1cc   :  { %v609_v19 = vmul.f32 %v601_v6, %v1019_v25  ;;  %v721_v40 = vmul.f32 %v713_v58, %v1021_v26  ;;  %v707_v7 = vmul.f32 %v699_v62, %v1019_v25  ;;  %v798_v58 = vld [vmem:[#allocation2 + $0x5] sm:$0x1] }
 0x1cd   :  { %v544_v17 = vrot.slane %v527_v27, 5  ;;  %v631_v31 = vadd.f32 %v623_v13, %v607_v8  ;;  %v723_v13 = vmul.f32 %v715_v63, %v1021_v26  ;;  %v806_v63 = vmul.f32 %v798_v58, %v1019_v25 }
 0x1cf   :  { %v545_v38 = vsel %vm336_vm3, %v544_v17, %v543_v36  ;;  %v644_v36 = vrot.slane %v628_v18, 6 }
 0x1d0   :  { %v547_v41 = vsel %vm339_vm4, %v546_v33, %v545_v38  ;;  %v643_v38 = vsel %vm330_vm1, %v642_v24, %v626_v16 }
 0x1d1   :  { %v549_v23 = vsel %vm342_vm5, %v548_v35, %v547_v41  ;;  %v632_v35 = vadd.f32 %v624_v15, %v608_v14  ;;  %v719_v15 = vld [vmem:[#allocation2 + $0x3d] sm:$0x1] }
 0x1d2   :  { %v551_v43 = vsel %vm345_vm6, %v550_v37, %v549_v23  ;;  %v633_v37 = vadd.f32 %v625_v21, %v609_v19  ;;  %v650_v23 = vrot.slane %v631_v31, 3  ;;  %v731_v31 = vadd.f32 %v723_v13, %v707_v7 }
 0x1d3   :  { %v553_v44 = vsel %vm348_vm7, %v552_v39, %v551_v43  ;;  %v645_v43 = vsel %vm333_vm2, %v644_v36, %v643_v38 }
 0x1d4   :  { %558 = vxpose.xlu1.b32.start.end [1/1] (short) (narrow) %v553_v44, 8  ;;  %v555_v45 = vsub.f32 %v1067_v34, %v553_v44  ;;  %v196_v34 = vmul.f32 %v994_v12, %v1153_v48  ;;  %v654_v47 = vrot.slane %v633_v37, 1  ;;  %v714_v48 = vld [vmem:[#allocation2 + $0x15] sm:$0x1] }
 0x1d6   :  { %557 = vst.msk [vmem:[#allocation3 + $0x20] sm:$0xff] %vm267_vm0, %v555_v45  ;;  %v1157_v50 = vadd.f32 %v196_v34, %v195_v49  ;;  %v652_v45 = vrot.slane %v632_v35, 2 }
 0x1d8   :  { %198 = vxpose.xlu0.b32.start.end [1/1] (short) (narrow) %v1157_v50, 8 }
 0x254   :  { %v574_v32 = vpop.trf.xlu1 }
 0x255   :  { %v590_v28 = vsub.f32 %v1097_v9, %v574_v32  ;;  %v621_v9 = vmul.f32 %v613_v59, %v1021_v26  ;;  %v696_v59 = vld [vmem:[#allocation2 + $0x4] sm:$0x1] }
 0x256   :  { %v704_v1 = vmul.f32 %v696_v59, %v1019_v25  ;;  %v800_v59 = vld [vmem:[#allocation2 + $0x15] sm:$0x1] }
 0x257   :  { %591 = vst.msk [vmem:[#allocation2 + $0x20] sm:$0xff] %vm267_vm0, %v590_v28  ;;  %v629_v22 = vadd.f32 %v621_v9, %v605_v3  ;;  %v697_v28 = vld [vmem:[#allocation2 + $0xc] sm:$0x1]  ;;  %v720_v3 = vmul.f32 %v712_v10, %v1021_v26  ;;  %v722_v9 = vmul.f32 %v714_v48, %v1021_v26  ;;  %v814_v10 = vld [vmem:[#allocation2 + $0x6] sm:$0x1] }
 0x258   :  { %v1187_v32 = vpop.trf.xlu0  ;;  %v705_v60 = vmul.f32 %v697_v28, %v1019_v25  ;;  %v815_v28 = vld [vmem:[#allocation2 + $0xe] sm:$0x1]  ;;  %v801_v48 = vld [vmem:[#allocation2 + $0x1d] sm:$0x1] }
 0x259   :  { %v646_v39 = vrot.slane %v629_v22, 5  ;;  %695 = vst.msk [vmem:[#allocation2 + $0x30] sm:$0xff] %vm267_vm0, %v1187_v32  ;;  %v728_v18 = vadd.f32 %v720_v3, %v704_v1  ;;  %v730_v22 = vadd.f32 %v722_v9, %v706_v4  ;;  %v823_v11 = vmul.f32 %v815_v28, %v1021_v26 }
 0x25a   :  { %v729_v5 = vadd.f32 %v721_v40, %v705_v60  ;;  %v816_v40 = vld [vmem:[#allocation2 + $0x16] sm:$0x1]  ;;  %v822_v4 = vmul.f32 %v814_v10, %v1021_v26 }
 0x25b   :  { %v647_v46 = vsel %vm336_vm3, %v646_v39, %v645_v43  ;;  %v746_v38 = vrot.slane %v730_v22, 6  ;;  %v748_v43 = vrot.slane %v731_v31, 5  ;;  %v824_v9 = vmul.f32 %v816_v40, %v1021_v26 }
 0x25c   :  { %v744_v24 = vrot.slane %v729_v5, 7  ;;  %v809_v5 = vmul.f32 %v801_v48, %v1019_v25 }
 0x25e   :  { %v598_v27 = vld [vmem:[#allocation2 + $0x23] sm:$0x1]  ;;  %v614_v30 = vld [vmem:[#allocation2 + $0x24] sm:$0x1]  ;;  %v716_v2 = vld [vmem:[#allocation2 + $0x25] sm:$0x1]  ;;  %v745_v37 = vsel %vm330_vm1, %v744_v24, %v728_v18 }
 0x25f   :  { %v606_v33 = vmul.f32 %v598_v27, %v1019_v25  ;;  %v622_v17 = vmul.f32 %v614_v30, %v1021_v26  ;;  %v724_v16 = vmul.f32 %v716_v2, %v1021_v26  ;;  %v727_v30 = vmul.f32 %v719_v15, %v1021_v26  ;;  %v802_v62 = vld [vmem:[#allocation2 + $0x25] sm:$0x1] }
 0x260   :  { %v702_v6 = vld [vmem:[#allocation2 + $0x34] sm:$0x1]  ;;  %v718_v8 = vld [vmem:[#allocation2 + $0x35] sm:$0x1]  ;;  %v808_v2 = vmul.f32 %v800_v59, %v1019_v25  ;;  %v810_v13 = vmul.f32 %v802_v62, %v1019_v25 }
 0x261   :  { %v630_v41 = vadd.f32 %v622_v17, %v606_v33  ;;  %v710_v19 = vmul.f32 %v702_v6, %v1019_v25  ;;  %v726_v21 = vmul.f32 %v718_v8, %v1021_v26 }
 0x262   :  { %v832_v18 = vadd.f32 %v824_v9, %v808_v2 }
 0x263   :  { %v648_v44 = vrot.slane %v630_v41, 4  ;;  %v734_v36 = vadd.f32 %v726_v21, %v710_v19 }
 0x264   :  { %v848_v31 = vrot.slane %v832_v18, 6 }
 0x265   :  { %v649_v49 = vsel %vm339_vm4, %v648_v44, %v647_v46  ;;  %v747_v46 = vsel %vm333_vm2, %v746_v38, %v745_v37 }
 0x266   :  { %v651_v34 = vsel %vm342_vm5, %v650_v23, %v649_v49  ;;  %v749_v49 = vsel %vm336_vm3, %v748_v43, %v747_v46 }
 0x267   :  { %v653_v29 = vsel %vm345_vm6, %v652_v45, %v651_v34 }
 0x268   :  { %v655_v51 = vsel %vm348_vm7, %v654_v47, %v653_v29  ;;  %v754_v47 = vrot.slane %v734_v36, 2 }
 0x269   :  { %660 = vxpose.xlu1.b32.start.end [1/1] (short) (narrow) %v655_v51, 8  ;;  %v657_v52 = vsub.f32 %v1112_v42, %v655_v51  ;;  %v233_v42 = vmul.f32 %v994_v12, %v22_v55  ;;  %v700_v12 = vld [vmem:[#allocation2 + $0x24] sm:$0x1] }
 0x26a   :  { %v708_v14 = vmul.f32 %v700_v12, %v1019_v25 }
 0x26b   :  { %659 = vst.msk [vmem:[#allocation3 + $0x28] sm:$0xff] %vm267_vm0, %v657_v52  ;;  %v1199_v57 = vadd.f32 %v233_v42, %v232_v56  ;;  %v799_v42 = vld [vmem:[#allocation2 + $0xd] sm:$0x1] }
 0x26c   :  { %v732_v33 = vadd.f32 %v724_v16, %v708_v14  ;;  %v807_v60 = vmul.f32 %v799_v42, %v1019_v25  ;;  %v830_v16 = vadd.f32 %v822_v4, %v806_v63 }
 0x26d   :  { %235 = vxpose.xlu0.b32.start.end [1/1] (short) (narrow) %v1199_v57, 8 }
 0x26e   :  { %v750_v44 = vrot.slane %v732_v33, 4  ;;  %v831_v7 = vadd.f32 %v823_v11, %v807_v60 }
 0x270   :  { %v751_v51 = vsel %vm339_vm4, %v750_v44, %v749_v49  ;;  %v846_v24 = vrot.slane %v831_v7, 7 }
 0x272   :  { %v847_v36 = vsel %vm330_vm1, %v846_v24, %v830_v16 }
 0x273   :  { %v849_v44 = vsel %vm333_vm2, %v848_v31, %v847_v36 }
 0x2e9   :  { %v676_v61 = vpop.trf.xlu1 }
 0x2ea   :  { %v692_v0 = vsub.f32 %v1142_v20, %v676_v61  ;;  %v703_v20 = vld [vmem:[#allocation2 + $0x3c] sm:$0x1]  ;;  %v817_v61 = vld [vmem:[#allocation2 + $0x1e] sm:$0x1] }
 0x2eb   :  { %v711_v27 = vmul.f32 %v703_v20, %v1019_v25  ;;  %v825_v6 = vmul.f32 %v817_v61, %v1021_v26 }
 0x2ec   :  { %693 = vst.msk [vmem:[#allocation2 + $0x28] sm:$0xff] %vm267_vm0, %v692_v0  ;;  %v818_v0 = vld [vmem:[#allocation2 + $0x26] sm:$0x1] }
 0x2ed   :  { %v735_v23 = vadd.f32 %v727_v30, %v711_v27  ;;  %v1229_v56 = vpop.trf.xlu0  ;;  %v833_v22 = vadd.f32 %v825_v6, %v809_v5 }
 0x2ee   :  { %797 = vst.msk [vmem:[#allocation2 + $0x38] sm:$0xff] %vm267_vm0, %v1229_v56 }
 0x2ef   :  { %v756_v29 = vrot.slane %v735_v23, 1  ;;  %v850_v37 = vrot.slane %v833_v22, 5 }
 0x2f3   :  { %v701_v17 = vld [vmem:[#allocation2 + $0x2c] sm:$0x1]  ;;  %v717_v35 = vld [vmem:[#allocation2 + $0x2d] sm:$0x1]  ;;  %v819_v3 = vld [vmem:[#allocation2 + $0x2e] sm:$0x1] }
 0x2f4   :  { %v709_v39 = vmul.f32 %v701_v17, %v1019_v25  ;;  %v725_v41 = vmul.f32 %v717_v35, %v1021_v26  ;;  %v803_v1 = vld [vmem:[#allocation2 + $0x2d] sm:$0x1]  ;;  %v827_v15 = vmul.f32 %v819_v3, %v1021_v26 }
 0x2f5   :  { %v805_v8 = vld [vmem:[#allocation2 + $0x3d] sm:$0x1]  ;;  %v821_v20 = vld [vmem:[#allocation2 + $0x3e] sm:$0x1]  ;;  %v811_v14 = vmul.f32 %v803_v1, %v1019_v25 }
 0x2f6   :  { %v733_v45 = vadd.f32 %v725_v41, %v709_v39  ;;  %v813_v19 = vmul.f32 %v805_v8, %v1019_v25  ;;  %v829_v21 = vmul.f32 %v821_v20, %v1021_v26 }
 0x2f7   :  { %v835_v30 = vadd.f32 %v827_v15, %v811_v14 }
 0x2f8   :  { %v752_v34 = vrot.slane %v733_v45, 3  ;;  %v837_v35 = vadd.f32 %v829_v21, %v813_v19  ;;  %v851_v45 = vsel %vm336_vm3, %v850_v37, %v849_v44 }
 0x2f9   :  { %v854_v23 = vrot.slane %v835_v30, 3 }
 0x2fa   :  { %v753_v52 = vsel %vm342_vm5, %v752_v34, %v751_v51  ;;  %v858_v46 = vrot.slane %v837_v35, 1 }
 0x2fb   :  { %v755_v53 = vsel %vm345_vm6, %v754_v47, %v753_v52 }
 0x2fc   :  { %v757_v54 = vsel %vm348_vm7, %v756_v29, %v755_v53 }
 0x2fd   :  { %762 = vxpose.xlu1.b32.start.end [1/1] (short) (narrow) %v757_v54, 8  ;;  %v759_v55 = vsub.f32 %v1157_v50, %v757_v54 }
 0x2ff   :  { %761 = vst.msk [vmem:[#allocation3 + $0x30] sm:$0xff] %vm267_vm0, %v759_v55 }
 0x37d   :  { %v778_v50 = vpop.trf.xlu1 }
 0x37e   :  { %v794_v12 = vsub.f32 %v1187_v32, %v778_v50  ;;  %v826_v32 = vmul.f32 %v818_v0, %v1021_v26 }
 0x380   :  { %795 = vst.msk [vmem:[#allocation2 + $0x30] sm:$0xff] %vm267_vm0, %v794_v12  ;;  %v834_v27 = vadd.f32 %v826_v32, %v810_v13 }
 0x382   :  { %v852_v41 = vrot.slane %v834_v27, 4 }
 0x384   :  { %v853_v47 = vsel %vm339_vm4, %v852_v41, %v851_v45 }
 0x385   :  { %v855_v34 = vsel %vm342_vm5, %v854_v23, %v853_v47 }
 0x387   :  { %v804_v33 = vld [vmem:[#allocation2 + $0x35] sm:$0x1]  ;;  %v820_v17 = vld [vmem:[#allocation2 + $0x36] sm:$0x1] }
 0x388   :  { %v812_v38 = vmul.f32 %v804_v33, %v1019_v25  ;;  %v828_v39 = vmul.f32 %v820_v17, %v1021_v26 }
 0x38a   :  { %v836_v43 = vadd.f32 %v828_v39, %v812_v38 }
 0x38c   :  { %v856_v49 = vrot.slane %v836_v43, 2 }
 0x38e   :  { %v857_v29 = vsel %vm345_vm6, %v856_v49, %v855_v34 }
 0x38f   :  { %v859_v51 = vsel %vm348_vm7, %v858_v46, %v857_v29 }
 0x390   :  { %864 = vxpose.xlu1.b32.start.end [1/1] (short) (narrow) %v859_v51, 8  ;;  %v861_v25 = vsub.f32 %v1199_v57, %v859_v51 }
 0x392   :  { %863 = vst.msk [vmem:[#allocation3 + $0x38] sm:$0xff] %vm267_vm0, %v861_v25 }
 0x393   :  { %929 = shalt.err (!%p926_p4)
}
 0x394   :  { %s930_s7 = scalar_lea.hbm %s1277_s3, 1024 }
 0x395   :  { %p931_p5 = scmp.ne.s32.totalorder %s1277_s3, %s930_s7  ;;  %p934_p6 = scmp.lt.u32.totalorder %s930_s7, %s1277_s3 }
 0x397   :  { %p936_p7 = pnand %p934_p6, %p931_p5 }
 0x399   :  { %939 = shalt.err (!%p936_p7)
}
 0x39a   :  { %s944_s12 = smov 128   ;;  %s945_s13 = smov 8  }
 0x39b   :  { %909 = dma.vmem_to_hbm [thread:$0]  %s904_s30, 1024, %s1277_s3, [#allocation4], %s944_s12, %s944_s12, %s945_s13  }
 0x410   :  { %v880_v26 = vpop.trf.xlu1 }
 0x411   :  { %v896_v57 = vsub.f32 %v1229_v56, %v880_v26 }
 0x413   :  { %897 = vst.msk [vmem:[#allocation2 + $0x38] sm:$0xff] %vm267_vm0, %v896_v57 }
 0x414   :  { %940 = dma.done.wait [#allocation4], 1024  }
 0x415   :  { %941 = vsyncadd [#allocation4], 4294966272 }
 0x416   :  { %913 = vsyncpa [#allocation4], 1 }

</bundles_post_ra>
